<compile_context>
chip_gen: v5e
topology: v5e:2x2
jax: 0.10.0
libtpu: 0.0.40
codegen_flags: <defaults>
</compile_context>

<pallas_src>
import functools

import jax
import jax.numpy as jnp
from jax import lax
from jax.experimental import pallas as pl
from jax.experimental.pallas import tpu as pltpu


def _round_up(x, m):
    return ((x + m - 1) // m) * m


def _center_loss_kernel(f_ref, center_ref, t_ref, out_ref, *,
                        tiles_per_core, batch):
    p = pl.program_id(0)          # core-split index (parallel axis)
    i = pl.program_id(1)          # batch-tile index (reduction axis)

    @pl.when(i == 0)
    def _():
        out_ref[...] = jnp.zeros_like(out_ref)

    f = f_ref[...].astype(jnp.float32)              # (bt, D)
    centers = center_ref[...].astype(jnp.float32)   # (C, D)
    t = t_ref[...]                                  # (bt, 1) int32

    bt = f.shape[0]
    c_num = centers.shape[0]

    # Row validity against the true (unpadded) batch size.  The tail tile
    # (and any fully-out-of-range tile created by the ceil-div core split)
    # reads unspecified data; everything it produces is zeroed below.
    tile_idx = p * tiles_per_core + i
    row_ids = tile_idx * bt + lax.broadcasted_iota(jnp.int32, (bt, 1), 0)
    valid = row_ids < batch                          # (bt, 1) bool

    # One-hot labels, zeroed for invalid rows (their garbage label could
    # otherwise alias a real class).
    onehot = jnp.where(
        valid & (t == lax.broadcasted_iota(jnp.int32, (bt, c_num), 1)),
        1.0, 0.0).astype(jnp.float32)                # (bt, C)

    # Per-sample center gather on the MXU + Euclidean distance in f32.
    c = jnp.dot(onehot, centers, preferred_element_type=jnp.float32)   # (bt, D)
    diff = f - c
    d = jnp.sqrt(jnp.sum(diff * diff, axis=-1, keepdims=True))          # (bt, 1)
    # OOB feature rows may hold NaN/Inf bit patterns; NaN * 0 is still NaN,
    # so force them to zero rather than relying on the zero one-hot row.
    d = jnp.where(valid, d, 0.0)

    # Fused per-class reduction on the MXU (contraction over the batch rows):
    #   part[c, 0] = sum_{i: t_i == c} d_i     (per-class distance sum)
    #   part[c, 1] = sum_{i: t_i == c} 1       (per-class histogram count)
    rhs = jnp.concatenate([d, valid.astype(jnp.float32)], axis=1)        # (bt, 2)
    part = lax.dot_general(
        onehot, rhs,
        dimension_numbers=(((0,), (0,)), ((), ())),
        preferred_element_type=jnp.float32)                              # (C, 2)
    out_ref[...] += part.reshape(out_ref.shape)


def center_loss(f, centers, t, *, b_tile=2048, n_parallel=1,
                core_parallel=False, vmem_limit_bytes=None):
    """f: (B, D), centers: (cls_num, D), t: (B,) integer labels in [0, cls_num).

    Tuning notes (chip-generation budgets from the perf review):
      * v5e : keep b_tile <= 2048 (16 MiB default scoped VMEM), n_parallel=1.
      * v6e : b_tile up to ~8192 with vmem_limit_bytes raised (~64 MiB),
              n_parallel=1 (single TensorCore).
      * v7x : b_tile ~2048-4096 (32/64 MiB VMEM shared by 2 TCs); pass
              n_parallel=2, core_parallel=True to shard tiles across both
              TensorCores via pltpu.CORE_PARALLEL.
    bf16 features are supported end-to-end; the distance math is f32 in-kernel.
    """
    B, D = f.shape
    C, _ = centers.shape
    # TODO(synk): torch.histc hard-codes 10 bins over [0, 9]; this kernel uses
    #             cls_num bins, which matches only for integer labels in
    #             [0, 9] with cls_num == 10 (the module's intended usage).
    # TODO(synk): for very large b_tile the (bt, 1) label block lane-pads to
    #             128 lanes in VMEM; shipping labels as int8 would cut that
    #             stream 4x if more VMEM headroom is ever needed.

    t2 = t.astype(jnp.int32).reshape(B, 1)

    # Batch tile: multiple of 32 so f32/bf16 sublane packing stays aligned,
    # no larger than the (rounded-up) batch.  No input padding — the tail
    # tile is masked inside the kernel.
    bt = min(b_tile, _round_up(B, 32))
    bt = max(32, _round_up(bt, 32))
    tiles = pl.cdiv(B, bt)

    n_par = max(1, min(n_parallel, tiles))
    tiles_per_core = pl.cdiv(tiles, n_par)

    # The ceil-div core split can create logical tiles past the end of the
    # batch; clamp their block index (so the DMA reads in-range data) and let
    # the in-kernel row mask zero their contribution.
    def batch_map(p, i):
        return (jnp.minimum(p * tiles_per_core + i, tiles - 1), 0)

    lead_sem = pltpu.CORE_PARALLEL if core_parallel else pltpu.PARALLEL

    parts = pl.pallas_call(
        functools.partial(_center_loss_kernel,
                          tiles_per_core=tiles_per_core, batch=B),
        out_shape=jax.ShapeDtypeStruct((n_par, C, 2), jnp.float32),
        grid_spec=pltpu.PrefetchScalarGridSpec(
            num_scalar_prefetch=0,
            grid=(n_par, tiles_per_core),
            in_specs=[
                pl.BlockSpec((bt, D), batch_map),             # f (native dtype)
                pl.BlockSpec((C, D), lambda p, i: (0, 0)),    # centers
                pl.BlockSpec((bt, 1), batch_map),             # labels
            ],
            out_specs=pl.BlockSpec((1, C, 2), lambda p, i: (p, 0, 0)),
        ),
        compiler_params=pltpu.CompilerParams(
            dimension_semantics=(lead_sem, pltpu.ARBITRARY),
            vmem_limit_bytes=vmem_limit_bytes),
    )(f, centers, t2)

    # Tiny (C-sized) finalize: combine per-core partials, one divide per class.
    parts = jnp.sum(parts, axis=0)                  # (C, 2)
    dsum = parts[:, 0]
    hist = parts[:, 1]
    # Classes absent from the batch have dsum == 0, so max(hist, 1) only
    # avoids 0/0 and matches PyTorch (absent classes are never indexed).
    return jnp.sum(dsum / jnp.maximum(hist, 1.0))


def center_loss_ref(f, centers, t):
    """Pure-JAX reference mirroring the PyTorch forward."""
    t = t.astype(jnp.int32)
    c = centers[t]
    d = jnp.sqrt(jnp.sum((f.astype(jnp.float32) - c) ** 2, axis=-1))
    hist = jnp.sum(t[:, None] == jnp.arange(10)[None, :], axis=0).astype(jnp.float32)
    n = hist[t]
    return jnp.sum(d / n)


if __name__ == "__main__":
    cls_num, feature_dim = 10, 32

    key = jax.random.PRNGKey(0)
    k_center, k_f1, k_t1, k_f2, k_t2, k_f3, k_t3 = jax.random.split(key, 7)

    # nn.Parameter(torch.randn(cls_num, feature_dim)) -> deterministic normal init
    centers = jax.random.normal(k_center, (cls_num, feature_dim), dtype=jnp.float32)

    # Case 1: tiny batch, single tile, heavy in-kernel tail masking (8 of 32 rows valid).
    f1 = jax.random.normal(k_f1, (8, feature_dim), dtype=jnp.float32)
    t1 = jax.random.randint(k_t1, (8,), 0, cls_num, dtype=jnp.int32)
    out1 = jax.block_until_ready(center_loss(f1, centers, t1))
    ref1 = jax.block_until_ready(center_loss_ref(f1, centers, t1))
    assert jnp.allclose(out1, ref1, rtol=1e-4, atol=1e-4), (out1, ref1)

    # Case 2: multi-tile + ragged tail + ceil-div core split (logical tiles > real tiles).
    f2 = jax.random.normal(k_f2, (150, feature_dim), dtype=jnp.float32)
    t2 = jax.random.randint(k_t2, (150,), 0, cls_num, dtype=jnp.int32)
    out2 = jax.block_until_ready(center_loss(f2, centers, t2, b_tile=64, n_parallel=2))
    ref2 = jax.block_until_ready(center_loss_ref(f2, centers, t2))
    assert jnp.allclose(out2, ref2, rtol=1e-4, atol=1e-4), (out2, ref2)

    # Case 3: bf16 features end-to-end (HBM stream halved; in-kernel math stays f32).
    f3 = jax.random.normal(k_f3, (96, feature_dim), dtype=jnp.bfloat16)
    t3 = jax.random.randint(k_t3, (96,), 0, cls_num, dtype=jnp.int32)
    out3 = jax.block_until_ready(center_loss(f3, centers, t3, b_tile=32))
    ref3 = jax.block_until_ready(center_loss_ref(f3, centers, t3))
    assert jnp.allclose(out3, ref3, rtol=1e-4, atol=1e-4), (out3, ref3)

    print("KERNEL_OK")
</pallas_src>

<mosaic_0001>
module attributes {stable_mosaic.version = 11 : i64} {
  func.func @_center_loss_kernel(%arg0: i32, %arg1: i32, %arg2: memref<32x32xf32, #tpu.memory_space<vmem>>, %arg3: memref<10x32xf32, #tpu.memory_space<vmem>>, %arg4: memref<32x1xi32, #tpu.memory_space<vmem>>, %arg5: memref<1x10x2xf32, #tpu.memory_space<vmem>>) attributes {dimension_semantics = [#tpu.dimension_semantics<parallel>, #tpu.dimension_semantics<arbitrary>], iteration_bounds = array<i64: 1, 1>, scalar_prefetch = 0 : i64, scratch_operands = 0 : i64, tpu.core_type = #tpu.core_type<tc>, window_params = [{transform_indices = @transform_0, window_bounds = array<i64: 32, 32>}, {pipeline_mode = #tpu.pipeline_mode<synchronous>, transform_indices = @transform_1, window_bounds = array<i64: 10, 32>}, {transform_indices = @transform_2, window_bounds = array<i64: 32, 1>}, {transform_indices = @transform_3, window_bounds = array<i64: 1, 10, 2>}]} {
    %c0_i32 = arith.constant 0 : i32
    %0 = arith.cmpi eq, %arg1, %c0_i32 : i32
    %1 = arith.extui %0 : i1 to i32
    %c0_i32_0 = arith.constant 0 : i32
    %2 = arith.cmpi ne, %1, %c0_i32_0 : i32
    scf.if %2 {
      %cst_17 = arith.constant 0.000000e+00 : f32
      %38 = vector.broadcast %cst_17 : f32 to vector<1x10x2xf32>
      %c0_18 = arith.constant 0 : index
      %c0_19 = arith.constant 0 : index
      %c0_20 = arith.constant 0 : index
      %39 = vector.load %arg5[%c0_18, %c0_19, %c0_20] : memref<1x10x2xf32, #tpu.memory_space<vmem>>, vector<1x10x2xf32>
      tpu.vector_store %arg5[%c0_18, %c0_19, %c0_20], %38 {strides = array<i32>} : memref<1x10x2xf32, #tpu.memory_space<vmem>>, vector<1x10x2xf32>,
    } else {
    }
    %c0 = arith.constant 0 : index
    %c0_1 = arith.constant 0 : index
    %3 = vector.load %arg2[%c0, %c0_1] : memref<32x32xf32, #tpu.memory_space<vmem>>, vector<32x32xf32>
    %c0_2 = arith.constant 0 : index
    %c0_3 = arith.constant 0 : index
    %4 = vector.load %arg3[%c0_2, %c0_3] : memref<10x32xf32, #tpu.memory_space<vmem>>, vector<10x32xf32>
    %c0_4 = arith.constant 0 : index
    %c0_5 = arith.constant 0 : index
    %5 = vector.load %arg4[%c0_4, %c0_5] : memref<32x1xi32, #tpu.memory_space<vmem>>, vector<32x1xi32>
    %c1_i32 = arith.constant 1 : i32
    %6 = arith.muli %arg0, %c1_i32 : i32
    %7 = arith.addi %6, %arg1 : i32
    %c32_i32 = arith.constant 32 : i32
    %8 = arith.muli %7, %c32_i32 : i32
    %9 = tpu.iota {dimensions = array<i32: 0>} : vector<32x1xi32>
    %10 = vector.broadcast %8 : i32 to vector<32x1xi32>
    %11 = arith.addi %10, %9 : vector<32x1xi32>
    %c8_i32 = arith.constant 8 : i32
    %12 = vector.broadcast %c8_i32 : i32 to vector<32x1xi32>
    %13 = arith.cmpi slt, %11, %12 : vector<32x1xi32>
    %14 = tpu.iota {dimensions = array<i32: 1>} : vector<32x10xi32>
    %15 = vector.broadcast %5 : vector<32x1xi32> to vector<32x10xi32>
    %16 = arith.cmpi eq, %15, %14 : vector<32x10xi32>
    %17 = vector.broadcast %13 : vector<32x1xi1> to vector<32x10xi1>
    %18 = arith.andi %17, %16 : vector<32x10xi1>
    %cst = arith.constant 1.000000e+00 : f32
    %cst_6 = arith.constant 0.000000e+00 : f32
    %19 = vector.broadcast %cst : f32 to vector<32x10xf32>
    %20 = vector.broadcast %cst_6 : f32 to vector<32x10xf32>
    %21 = arith.select %18, %19, %20 : vector<32x10xi1>, vector<32x10xf32>
    %cst_7 = arith.constant dense<0.000000e+00> : vector<32x32xf32>
    %22 = tpu.matmul %21, %4, %cst_7 {dimension_numbers = #tpu.dot_dimension_numbers<[1], [0], [0], [1], [0, 0, 1, 1], [], []>} : vector<32x10xf32>, vector<10x32xf32>, vector<32x32xf32> -> vector<32x32xf32>
    %23 = arith.subf %3, %22 : vector<32x32xf32>
    %24 = arith.mulf %23, %23 : vector<32x32xf32>
    %cst_8 = arith.constant dense<0.000000e+00> : vector<32xf32>
    %25 = vector.multi_reduction <add>, %24, %cst_8 [1] : vector<32x32xf32> to vector<32xf32>
    %26 = vector.shape_cast %25 : vector<32xf32> to vector<32x1xf32>
    %27 = math.sqrt %26 : vector<32x1xf32>
    %cst_9 = arith.constant 0.000000e+00 : f32
    %28 = vector.broadcast %cst_9 : f32 to vector<32x1xf32>
    %29 = arith.select %13, %27, %28 : vector<32x1xi1>, vector<32x1xf32>
    %30 = arith.extui %13 : vector<32x1xi1> to vector<32x1xi32>
    %31 = arith.sitofp %30 : vector<32x1xi32> to vector<32x1xf32>
    %32 = tpu.concatenate %29, %31 in 1 : vector<32x1xf32>, vector<32x1xf32> -> vector<32x2xf32>
    %cst_10 = arith.constant dense<0.000000e+00> : vector<10x2xf32>
    %33 = tpu.matmul %21, %32, %cst_10 {dimension_numbers = #tpu.dot_dimension_numbers<[0], [0], [1], [1], [0, 1, 1, 1], [], []>} : vector<32x10xf32>, vector<32x2xf32>, vector<10x2xf32> -> vector<10x2xf32>
    %c0_11 = arith.constant 0 : index
    %c0_12 = arith.constant 0 : index
    %c0_13 = arith.constant 0 : index
    %34 = vector.load %arg5[%c0_11, %c0_12, %c0_13] : memref<1x10x2xf32, #tpu.memory_space<vmem>>, vector<1x10x2xf32>
    %35 = vector.shape_cast %33 : vector<10x2xf32> to vector<1x10x2xf32>
    %36 = arith.addf %34, %35 : vector<1x10x2xf32>
    %c0_14 = arith.constant 0 : index
    %c0_15 = arith.constant 0 : index
    %c0_16 = arith.constant 0 : index
    %37 = vector.load %arg5[%c0_14, %c0_15, %c0_16] : memref<1x10x2xf32, #tpu.memory_space<vmem>>, vector<1x10x2xf32>
    tpu.vector_store %arg5[%c0_14, %c0_15, %c0_16], %36 {strides = array<i32>} : memref<1x10x2xf32, #tpu.memory_space<vmem>>, vector<1x10x2xf32>,
    return
  }
  func.func @transform_0(%arg0: i32, %arg1: i32) -> (i32, i32) {
    %c1_i32 = arith.constant 1 : i32
    %0 = arith.muli %arg0, %c1_i32 : i32
    %1 = arith.addi %0, %arg1 : i32
    %c0_i32 = arith.constant 0 : i32
    %2 = arith.minsi %1, %c0_i32 : i32
    %c0_i32_0 = arith.constant 0 : i32
    %c0_i32_1 = arith.constant 0 : i32
    return %2, %c0_i32_0 : i32, i32
  }
  func.func @transform_1(%arg0: i32, %arg1: i32) -> (i32, i32) {
    %c0_i32 = arith.constant 0 : i32
    %c0_i32_0 = arith.constant 0 : i32
    %c0_i32_1 = arith.constant 0 : i32
    return %c0_i32, %c0_i32_0 : i32, i32
  }
  func.func @transform_2(%arg0: i32, %arg1: i32) -> (i32, i32) {
    %c1_i32 = arith.constant 1 : i32
    %0 = arith.muli %arg0, %c1_i32 : i32
    %1 = arith.addi %0, %arg1 : i32
    %c0_i32 = arith.constant 0 : i32
    %2 = arith.minsi %1, %c0_i32 : i32
    %c0_i32_0 = arith.constant 0 : i32
    %c0_i32_1 = arith.constant 0 : i32
    return %2, %c0_i32_0 : i32, i32
  }
  func.func @transform_3(%arg0: i32, %arg1: i32) -> (i32, i32, i32) {
    %c0_i32 = arith.constant 0 : i32
    %c0_i32_0 = arith.constant 0 : i32
    %c0_i32_1 = arith.constant 0 : i32
    return %arg0, %c0_i32, %c0_i32_0 : i32, i32, i32
  }
}

</mosaic_0001>

<bundles_post_ra>
// kernel: tpu_custom_call.1
= control target key start
LH: loop header
LB: loop body
LE: loop exit
PB: predicated region body
PF: predicated region fallthrough
CT: control target
= control target key end

     0   :  { %8 = vsyncpa [#allocation3], 0  ;;  %s438_s15 = smov [#allocation2]   ;;  %s439_s17 = smov 128   ;;  %s495_s0 = inlined_call_operand.vmem [shape: f32[8,32], index: 0, kind: input, shape index: {}]   ;;  %s496_s1 = inlined_call_operand.hbm [shape: f32[10,32], index: 1, kind: input, shape index: {}]   ;;  %s497_s2 = inlined_call_operand.vmem [shape: s32[8,1], index: 2, kind: input, shape index: {}]   ;;  %s498_s3 = inlined_call_operand.vmem [shape: f32[1,10,2], index: 3, kind: output, shape index: {}]  }
   0x1   :  { %s31_s14 = sshll.u32 %s496_s1, 4  ;;  %s33_s16 = sshll.u32 %s438_s15, 4  ;;  %s32_s14 = int_to_ptr.hbm [resolvable:$true] %s31_s14  ;;  %s34_s16 = int_to_ptr.vmem [resolvable:$true] %s33_s16 }
   0x2   :  { %s440_s18 = smov 8  }
   0x3   :  { %39 = dma.hbm_to_vmem [thread:$0]  %s32_s14, 256, %s34_s16, [#allocation3], %s439_s17, %s439_s17, %s440_s18  }
   0x4   :  { %436 = dma.done.wait [#allocation3], 256  }
   0x5   :  { %437 = vsyncadd [#allocation3], 4294967040  ;;  %v441_v0 = vmov 0   ;;  %v128_v1 = vld [vmem:[%s497_s2] sm:$0xff]  ;;  %v127_v2 = vld [vmem:[#allocation2 + $0x8] sm:$0x3]  ;;  %v148_v5 = vlaneseq }
   0x6   :  { %409 = vset.pattern.permute.xlu0 %v441_v0  ;;  %vm195_vm0 = vcmask 1041408   ;;  %v126_v3 = vld [vmem:[#allocation2] sm:$0xff]  ;;  %v442_v4 = vmov 0.0   ;;  %vm182_vm1 = vcmask 80896   ;;  %vm236_vm3 = vcmask 261120  }
   0x7   :  { %151 = vperm.xlu0 %409, %v128_v1   ;;  %396 = vmatpush.msk.msra.mxu0 %vm195_vm0, %v127_v2  ;;  %v149_v6 = vand.u32 127, %v148_v5  ;;  %v122_v12 = vld [vmem:[%s495_s0] sm:$0xff]  ;;  %vm118_vm4 = vcmask 15360   ;;  %vm305_vm6 = vcmask 7168   ;;  %vm120_vm8 = vcmask 9216  }
   0x8   :  { %400 = vmatpush.msk.msra.mxu2 %vm195_vm0, %v127_v2  ;;  %401 = vmatpush.msk.msra.mxu3 %vm195_vm0, %v127_v2  ;;  %119 = vst.msk [vmem:[%s498_s3] sm:$0xff] %vm118_vm4, %v442_v4 }
   0x9   :  { %214 = vmatpush.msra.mxu0 %v126_v3  ;;  %121 = vst.msk [vmem:[%s498_s3 + $0x8] sm:$0x3] %vm120_vm8, %v442_v4 }
   0xa   :  { %402 = vmatpush.msra.mxu2 %v126_v3  ;;  %403 = vmatpush.msra.mxu3 %v126_v3 }
   0xb   :  { %218 = vmatmul.f32.vlgmr.msra.gmra.mxu2 %v442_v4  ;;  %224 = vmatmul.f32.vlgmr.msra.gmra.mxu3 %v442_v4 }
   0xf   :  { %v371_v31 = vld [vmem:[%s498_s3] sm:$0xff] }
  0x10   :  { %v372_v34 = vld [vmem:[%s498_s3 + $0x8] sm:$0x3] }
  0x13   :  { %221 = vmatmul.f32.gmra.mxu2 %v442_v4 }
  0x79   :  { %v152_v7 = vpop.permute.xlu0 %151 }
  0x7a   :  { %vm162_vm2 = vcmp.eq.s32.totalorder %v152_v7, %v149_v6 }
  0x7b   :  { %v178_v8 = vsel %vm162_vm2, 1.0, %v442_v4 }
  0x7c   :  { %310 = vxpose.xlu1.b32.start.end [1/1] (short) (narrow) %v178_v8, 16  ;;  %397 = vmatmul.msk.f32.vlgmr.msra.gmra.mxu0 %vm182_vm1, %v178_v8 }
  0x8e   :  { %v219_v9 = vpop.f32.mrf.mxu2  ;;  %v225_v10 = vpop.f32.mrf.mxu3 }
  0x96   :  { %v222_v11 = vpop.f32.mrf.mxu2 }
  0xf9   :  { %v216_v13 = vpop.f32.mrf.mxu0 }
  0xfa   :  { %v228_v14 = vsub.f32 %v122_v12, %v216_v13 }
  0xfc   :  { %v232_v15 = vmul.f32 %v228_v14, %v228_v14 }
  0xfe   :  { %v237_v16 = vsel %vm236_vm3, %v232_v15, 0.0 }
  0xff   :  { %238 = vadd.xlane.f32.xlu0 %v237_v16 }
 0x120   :  { %v326_v25 = vpop.trf.xlu1 }
 0x128   :  { %v327_v30 = vpop.trf.xlu1 }
 0x172   :  { %v239_v17 = vpop.xlane.xlu0 %238 }
 0x173   :  { %410 = vrsqrt.f32 %v239_v17  ;;  %vm256_vm5 = vcmp.eq.f32.partialorder %v239_v17, inf  ;;  %v259_v26 = vand.u32 2147483648, %v239_v17  ;;  %vm258_vm7 = vcmp.eq.f32.partialorder %v239_v17, 0.0 }
 0x179   :  { %v411_v18 = vpop.eup %410 }
 0x17a   :  { %v250_v19 = vmul.f32 %v411_v18, %v239_v17 }
 0x17c   :  { %v251_v20 = vmul.f32 %v411_v18, %v250_v19 }
 0x17e   :  { %v252_v21 = vmul.f32 0.5, %v251_v20 }
 0x180   :  { %v253_v22 = vsub.f32 1.5, %v252_v21 }
 0x182   :  { %v254_v23 = vmul.f32 %v411_v18, %v253_v22 }
 0x184   :  { %v255_v24 = vmul.f32 %v254_v23, %v239_v17 }
 0x186   :  { %v257_v27 = vsel %vm256_vm5, %v239_v17, %v255_v24 }
 0x187   :  { %v260_v28 = vsel %vm258_vm7, %v259_v26, %v257_v27 }
 0x188   :  { %v306_v29 = vsel %vm305_vm6, %v260_v28, 1.0 }
 0x189   :  { %363 = vmatpush.msra.mxu1 %v306_v29 }
 0x18a   :  { %398 = vmatmul.msk.f32.vlgmr.msra.gmra.mxu1 %vm236_vm3, %v326_v25 }
 0x192   :  { %399 = vmatmul.msk.f32.gmra.mxu1 %vm236_vm3, %v327_v30 }
 0x207   :  { %v365_v32 = vpop.f32.mrf.mxu1 }
 0x208   :  { %v373_v33 = vadd.f32 %v371_v31, %v365_v32 }
 0x20a   :  { %376 = vst.msk [vmem:[%s498_s3] sm:$0xff] %vm118_vm4, %v373_v33 }
 0x20f   :  { %v368_v35 = vpop.f32.mrf.mxu1 }
 0x210   :  { %v374_v36 = vadd.f32 %v372_v34, %v368_v35 }
 0x212   :  { %378 = vst.msk [vmem:[%s498_s3 + $0x8] sm:$0x3] %vm120_vm8, %v374_v36 }
 0x213   :  { %383 = vsyncpa [#allocation3], 1 }

</bundles_post_ra>
